<compile_context>
chip_gen: v5e
topology: v5e:2x2
jax: 0.10.0
libtpu: 0.0.40
codegen_flags: <defaults>
</compile_context>

<pallas_src>
import functools

import jax
import jax.numpy as jnp
from jax import lax
from jax.experimental import pallas as pl
from jax.experimental.pallas import tpu as pltpu


LANES = 128       # TPU lane width; every packed weight block is 128 lanes wide.
MAX_TILE_B = 2048  # ~2.4 MB double-buffered per step: fits v5e/v6e/v7x scoped VMEM.


def _round_up(n, m):
    return ((n + m - 1) // m) * m


def actor_critic_kernel(x_ref, w_ref, b_ref, out_ref, *, s_pad, r1, r2, action_dim):
    """Fused 3-matmul ActorCritic forward on one batch tile.

    w_ref (packed weight slab, zero-padded to 128 lanes, dtype = compute dtype):
      rows [0, s_pad) : W0 (state -> h0)
      rows [r1, r2)   : W1 = [wa0 | wc0]          (128 K-rows)
      rows [r2, ...)  : W2 = block-diag(wa1, wc1) (128 K-rows)
    b_ref (f32, (8, 128)): row 0 = b0, row 1 = b1 (fused), row 2 = b2 (fused).
    """
    x = x_ref[...]                                   # (TB, s_pad), bf16 or f32
    cdt = w_ref.dtype                                # matmul compute dtype

    w0 = w_ref[0:s_pad, :]                           # (s_pad, 128)
    w1 = w_ref[r1:r2, :]                             # (128, 128)
    w2 = w_ref[r2:r2 + LANES, :]                     # (128, 128)
    b0 = b_ref[0:1, :]                               # (1, 128) f32
    b1 = b_ref[1:2, :]
    b2 = b_ref[2:3, :]

    # Feature layer: padded lanes stay exactly 0 (zero weight/bias columns).
    feat = jnp.maximum(
        jnp.dot(x, w0, preferred_element_type=jnp.float32) + b0, 0.0)

    # Fused actor/critic hidden layer: lanes [0:h1) actor, [h1:2h1) critic.
    h = jnp.maximum(
        jnp.dot(feat.astype(cdt), w1, preferred_element_type=jnp.float32) + b1, 0.0)

    # Fused output layer (block-diagonal): lanes [0:action_dim) actor logits,
    # lane action_dim = state value, remaining lanes are 0.
    z = jnp.dot(h.astype(cdt), w2, preferred_element_type=jnp.float32) + b2

    # Single-vreg (1, 128) mask, broadcast over the tile.
    lane = lax.broadcasted_iota(jnp.int32, (1, LANES), 1)
    out_ref[...] = jnp.where(lane < action_dim, jnp.tanh(z), z)


def pack_params(params, state_dim, action_dim, h0, h1, *, dtype=jnp.bfloat16):
    """Pack weights into one (rows, 128) slab (dtype) + one (8, 128) f32 bias slab."""
    assert h0 <= LANES and 2 * h1 <= LANES and action_dim + 1 <= LANES

    s_pad = _round_up(state_dim, 16)   # multiple of 16: aligned for bf16 sublane packing
    r1 = s_pad                         # start of W1 block (128 rows)
    r2 = r1 + LANES                    # start of W2 block (128 rows)
    rows = r2 + LANES

    w = jnp.zeros((rows, LANES), jnp.float32)
    # W0: feature Linear (state_dim -> h0)
    w = w.at[0:state_dim, 0:h0].set(params["wf0"])
    # W1: fused head layer 0 -> [wa0 | wc0]
    w = w.at[r1:r1 + h0, 0:h1].set(params["wa0"])
    w = w.at[r1:r1 + h0, h1:2 * h1].set(params["wc0"])
    # W2: fused head layer 1, block-diagonal
    w = w.at[r2:r2 + h1, 0:action_dim].set(params["wa1"])
    w = w.at[r2 + h1:r2 + 2 * h1, action_dim:action_dim + 1].set(params["wc1"])
    w = w.astype(dtype)

    b = jnp.zeros((8, LANES), jnp.float32)
    b = b.at[0, 0:h0].set(params["bf0"][0])
    b = b.at[1, 0:h1].set(params["ba0"][0])
    b = b.at[1, h1:2 * h1].set(params["bc0"][0])
    b = b.at[2, 0:action_dim].set(params["ba1"][0])
    b = b.at[2, action_dim].set(params["bc1"][0, 0])

    meta = dict(s_pad=s_pad, r1=r1, r2=r2, rows=rows)
    return w, b, meta


def _choose_tile_b(B, max_tile=MAX_TILE_B):
    """Pick a batch tile that avoids input padding and keeps VMEM in bounds."""
    if B <= max_tile:
        return B  # single tile: blocks equal full array dims, no padding needed
    for t in (2048, 1024, 512, 256, 128, 64, 32, 16):
        if t <= max_tile and B % t == 0:
            return t  # exact divisor -> no jnp.pad copy, >= 2 tiles for megacore
    return max_tile   # rare fallback: wrapper pads the remainder


def actor_critic_forward_packed(x, w_slab, b_slab, meta, action_dim, *, tile_b=None):
    """ActorCritic forward as one Pallas call.

    Returns the packed (B_padded, 128) f32 output slab:
      lanes [0:action_dim] = tanh(actor logits), lane action_dim = state value.
    Slice it with split_packed_output (inside the consumer's jit) to avoid an
    extra HBM round-trip on the hot path.
    """
    B, state_dim = x.shape
    s_pad, rows = meta["s_pad"], meta["rows"]

    x = x.astype(w_slab.dtype)                       # bf16 matmul operands by default
    if s_pad != state_dim:
        x = jnp.pad(x, ((0, 0), (0, s_pad - state_dim)))

    if tile_b is None:
        tile_b = _choose_tile_b(B)
    num_tiles = pl.cdiv(B, tile_b)
    b_padded = num_tiles * tile_b
    if b_padded != B:
        x = jnp.pad(x, ((0, b_padded - B), (0, 0)))

    kernel = functools.partial(
        actor_critic_kernel,
        s_pad=s_pad, r1=meta["r1"], r2=meta["r2"], action_dim=action_dim,
    )

    xbytes = x.dtype.itemsize
    wbytes = w_slab.size * w_slab.dtype.itemsize
    cost = pl.CostEstimate(
        flops=2 * b_padded * (s_pad * LANES + 2 * LANES * LANES),
        transcendentals=b_padded * LANES,
        bytes_accessed=(b_padded * s_pad * xbytes          # activations in
                        + wbytes + b_slab.size * 4          # resident slabs
                        + b_padded * LANES * 4),            # packed output
    )

    out = pl.pallas_call(
        kernel,
        out_shape=jax.ShapeDtypeStruct((b_padded, LANES), jnp.float32),
        grid=(num_tiles,),
        in_specs=[
            pl.BlockSpec((tile_b, s_pad), lambda i: (i, 0)),   # activation tile
            pl.BlockSpec((rows, LANES), lambda i: (0, 0)),     # weights stay resident
            pl.BlockSpec((8, LANES), lambda i: (0, 0)),        # biases stay resident
        ],
        out_specs=pl.BlockSpec((tile_b, LANES), lambda i: (i, 0)),
        compiler_params=pltpu.CompilerParams(
            dimension_semantics=("parallel",),
        ),
        cost_estimate=cost,
    )(x, w_slab, b_slab)

    return out


def split_packed_output(out, batch, action_dim):
    """Convenience split of the packed slab -> (action_values, state_value)."""
    return out[:batch, :action_dim], out[:batch, action_dim:action_dim + 1]


def init_params(key, state_dim, action_dim, hidden_dims):
    """Deterministic synthetic init. Weights stored as (in_dim, out_dim)."""
    assert len(hidden_dims) == 2, "this script instantiates hidden_dims=[h0, h1]"
    h0, h1 = hidden_dims
    ks = jax.random.split(key, 10)

    def lin(kw, kb, fan_in, fan_out):
        # PyTorch-style uniform(-1/sqrt(fan_in), 1/sqrt(fan_in)) init
        bound = 1.0 / jnp.sqrt(jnp.float32(fan_in))
        w = jax.random.uniform(kw, (fan_in, fan_out), jnp.float32, -bound, bound)
        b = jax.random.uniform(kb, (1, fan_out), jnp.float32, -bound, bound)
        return w, b

    wf0, bf0 = lin(ks[0], ks[1], state_dim, h0)   # feature Linear(state_dim, h0)
    wa0, ba0 = lin(ks[2], ks[3], h0, h1)          # actor   Linear(h0, h1)
    wa1, ba1 = lin(ks[4], ks[5], h1, action_dim)  # actor   Linear(h1, action_dim)
    wc0, bc0 = lin(ks[6], ks[7], h0, h1)          # critic  Linear(h0, h1)
    wc1, bc1 = lin(ks[8], ks[9], h1, 1)           # critic  Linear(h1, 1)

    return dict(wf0=wf0, bf0=bf0, wa0=wa0, ba0=ba0, wa1=wa1, ba1=ba1,
                wc0=wc0, bc0=bc0, wc1=wc1, bc1=bc1)


def reference_forward(x, p):
    """Pure-JAX reference for correctness checking (matches PyTorch module)."""
    feat = jnp.maximum(x @ p["wf0"] + p["bf0"], 0.0)
    a = jnp.maximum(feat @ p["wa0"] + p["ba0"], 0.0)
    a = jnp.tanh(a @ p["wa1"] + p["ba1"])
    c = jnp.maximum(feat @ p["wc0"] + p["bc0"], 0.0)
    c = c @ p["wc1"] + p["bc1"]
    return a, c


if __name__ == "__main__":
    state_dim, action_dim = 16, 4
    hidden_dims = [32, 32]
    batch = 8

    key = jax.random.PRNGKey(0)
    kx, kp = jax.random.split(key)
    x = jax.random.normal(kx, (batch, state_dim), jnp.float32)
    params = init_params(kp, state_dim, action_dim, hidden_dims)
    ref_a, ref_v = reference_forward(x, params)

    # Default path: bf16 matmul operands (halved input DMA), f32 elementwise/output.
    w_bf16, b_f32, meta = pack_params(params, state_dim, action_dim,
                                      hidden_dims[0], hidden_dims[1],
                                      dtype=jnp.bfloat16)
    out = actor_critic_forward_packed(x, w_bf16, b_f32, meta, action_dim)
    action, value = split_packed_output(out, batch, action_dim)
    jax.block_until_ready((action, value))
    assert action.shape == (batch, action_dim)
    assert value.shape == (batch, 1)
    assert jnp.allclose(action, ref_a, atol=5e-2, rtol=5e-2)   # bf16 tolerance
    assert jnp.allclose(value, ref_v, atol=5e-2, rtol=5e-2)

    # f32-slab path: exact check of packing / fused-head math against the reference.
    w_f32, b_f32b, meta32 = pack_params(params, state_dim, action_dim,
                                        hidden_dims[0], hidden_dims[1],
                                        dtype=jnp.float32)
    out32 = actor_critic_forward_packed(x, w_f32, b_f32b, meta32, action_dim)
    a32, v32 = split_packed_output(out32, batch, action_dim)
    jax.block_until_ready((a32, v32))
    assert jnp.allclose(a32, ref_a, atol=1e-5, rtol=1e-5)
    assert jnp.allclose(v32, ref_v, atol=1e-5, rtol=1e-5)

    print("KERNEL_OK")
</pallas_src>

<mosaic_0001>
module attributes {stable_mosaic.version = 11 : i64} {
  func.func @actor_critic_kernel(%arg0: i32, %arg1: memref<8x16xbf16, #tpu.memory_space<vmem>>, %arg2: memref<272x128xbf16, #tpu.memory_space<vmem>>, %arg3: memref<8x128xf32, #tpu.memory_space<vmem>>, %arg4: memref<8x128xf32, #tpu.memory_space<vmem>>) attributes {dimension_semantics = [#tpu.dimension_semantics<parallel>], iteration_bounds = array<i64: 1>, scalar_prefetch = 0 : i64, scratch_operands = 0 : i64, tpu.core_type = #tpu.core_type<tc>, window_params = [{transform_indices = @transform_0, window_bounds = array<i64: 8, 16>}, {pipeline_mode = #tpu.pipeline_mode<synchronous>, transform_indices = @transform_1, window_bounds = array<i64: 272, 128>}, {pipeline_mode = #tpu.pipeline_mode<synchronous>, transform_indices = @transform_2, window_bounds = array<i64: 8, 128>}, {transform_indices = @transform_3, window_bounds = array<i64: 8, 128>}]} {
    %c0 = arith.constant 0 : index
    %c0_0 = arith.constant 0 : index
    %0 = vector.load %arg1[%c0, %c0_0] : memref<8x16xbf16, #tpu.memory_space<vmem>>, vector<8x16xbf16>
    %c0_1 = arith.constant 0 : index
    %c0_2 = arith.constant 0 : index
    %1 = vector.load %arg2[%c0_1, %c0_2] : memref<272x128xbf16, #tpu.memory_space<vmem>>, vector<16x128xbf16>
    %c16 = arith.constant 16 : index
    %c0_3 = arith.constant 0 : index
    %2 = vector.load %arg2[%c16, %c0_3] : memref<272x128xbf16, #tpu.memory_space<vmem>>, vector<128x128xbf16>
    %c144 = arith.constant 144 : index
    %c0_4 = arith.constant 0 : index
    %3 = vector.load %arg2[%c144, %c0_4] : memref<272x128xbf16, #tpu.memory_space<vmem>>, vector<128x128xbf16>
    %c0_5 = arith.constant 0 : index
    %c0_6 = arith.constant 0 : index
    %4 = vector.load %arg3[%c0_5, %c0_6] : memref<8x128xf32, #tpu.memory_space<vmem>>, vector<1x128xf32>
    %c1 = arith.constant 1 : index
    %c0_7 = arith.constant 0 : index
    %5 = vector.load %arg3[%c1, %c0_7] : memref<8x128xf32, #tpu.memory_space<vmem>>, vector<1x128xf32>
    %c2 = arith.constant 2 : index
    %c0_8 = arith.constant 0 : index
    %6 = vector.load %arg3[%c2, %c0_8] : memref<8x128xf32, #tpu.memory_space<vmem>>, vector<1x128xf32>
    %cst = arith.constant dense<0.000000e+00> : vector<8x128xf32>
    %7 = tpu.matmul %0, %1, %cst {dimension_numbers = #tpu.dot_dimension_numbers<[1], [0], [0], [1], [0, 0, 1, 1], [], []>} : vector<8x16xbf16>, vector<16x128xbf16>, vector<8x128xf32> -> vector<8x128xf32>
    %8 = vector.broadcast %4 : vector<1x128xf32> to vector<8x128xf32>
    %9 = arith.addf %7, %8 : vector<8x128xf32>
    %cst_9 = arith.constant 0.000000e+00 : f32
    %10 = vector.broadcast %cst_9 : f32 to vector<8x128xf32>
    %11 = arith.maximumf %9, %10 : vector<8x128xf32>
    %12 = arith.truncf %11 : vector<8x128xf32> to vector<8x128xbf16>
    %cst_10 = arith.constant dense<0.000000e+00> : vector<8x128xf32>
    %13 = tpu.matmul %12, %2, %cst_10 {dimension_numbers = #tpu.dot_dimension_numbers<[1], [0], [0], [1], [0, 0, 1, 1], [], []>} : vector<8x128xbf16>, vector<128x128xbf16>, vector<8x128xf32> -> vector<8x128xf32>
    %14 = vector.broadcast %5 : vector<1x128xf32> to vector<8x128xf32>
    %15 = arith.addf %13, %14 : vector<8x128xf32>
    %cst_11 = arith.constant 0.000000e+00 : f32
    %16 = vector.broadcast %cst_11 : f32 to vector<8x128xf32>
    %17 = arith.maximumf %15, %16 : vector<8x128xf32>
    %18 = arith.truncf %17 : vector<8x128xf32> to vector<8x128xbf16>
    %cst_12 = arith.constant dense<0.000000e+00> : vector<8x128xf32>
    %19 = tpu.matmul %18, %3, %cst_12 {dimension_numbers = #tpu.dot_dimension_numbers<[1], [0], [0], [1], [0, 0, 1, 1], [], []>} : vector<8x128xbf16>, vector<128x128xbf16>, vector<8x128xf32> -> vector<8x128xf32>
    %20 = vector.broadcast %6 : vector<1x128xf32> to vector<8x128xf32>
    %21 = arith.addf %19, %20 : vector<8x128xf32>
    %22 = tpu.iota {dimensions = array<i32: 1>} : vector<1x128xi32>
    %c4_i32 = arith.constant 4 : i32
    %23 = vector.broadcast %c4_i32 : i32 to vector<1x128xi32>
    %24 = arith.cmpi slt, %22, %23 : vector<1x128xi32>
    %25 = math.tanh %21 : vector<8x128xf32>
    %26 = vector.shape_cast %24 : vector<1x128xi1> to vector<1x128xi1>
    %27 = vector.broadcast %26 : vector<1x128xi1> to vector<8x128xi1>
    %28 = arith.select %27, %25, %21 : vector<8x128xi1>, vector<8x128xf32>
    %c0_13 = arith.constant 0 : index
    %c0_14 = arith.constant 0 : index
    %29 = vector.load %arg4[%c0_13, %c0_14] : memref<8x128xf32, #tpu.memory_space<vmem>>, vector<8x128xf32>
    tpu.vector_store %arg4[%c0_13, %c0_14], %28 {strides = array<i32>} : memref<8x128xf32, #tpu.memory_space<vmem>>, vector<8x128xf32>,
    return
  }
  func.func @transform_0(%arg0: i32) -> (i32, i32) {
    %c0_i32 = arith.constant 0 : i32
    %c0_i32_0 = arith.constant 0 : i32
    return %arg0, %c0_i32 : i32, i32
  }
  func.func @transform_1(%arg0: i32) -> (i32, i32) {
    %c0_i32 = arith.constant 0 : i32
    %c0_i32_0 = arith.constant 0 : i32
    %c0_i32_1 = arith.constant 0 : i32
    return %c0_i32, %c0_i32_0 : i32, i32
  }
  func.func @transform_2(%arg0: i32) -> (i32, i32) {
    %c0_i32 = arith.constant 0 : i32
    %c0_i32_0 = arith.constant 0 : i32
    %c0_i32_1 = arith.constant 0 : i32
    return %c0_i32, %c0_i32_0 : i32, i32
  }
  func.func @transform_3(%arg0: i32) -> (i32, i32) {
    %c0_i32 = arith.constant 0 : i32
    %c0_i32_0 = arith.constant 0 : i32
    return %arg0, %c0_i32 : i32, i32
  }
}

</mosaic_0001>

<bundles_post_ra>
// kernel: tpu_custom_call.1
= control target key start
LH: loop header
LB: loop body
LE: loop exit
PB: predicated region body
PF: predicated region fallthrough
CT: control target
= control target key end

     0   :  { %8 = vsyncpa [#allocation3], 0  ;;  %s512_s0 = inlined_call_operand.hbm [shape: bf16[8,16], index: 0, kind: input, shape index: {}]   ;;  %s513_s1 = inlined_call_operand.hbm [shape: bf16[272,128], index: 1, kind: input, shape index: {}]   ;;  %s514_s2 = inlined_call_operand.hbm [shape: f32[8,128], index: 2, kind: input, shape index: {}]   ;;  %s515_s3 = inlined_call_operand.hbm [shape: f32[8,128], index: 3, kind: output, shape index: {}]  }
   0x1   :  { %9 = vsyncpa [#allocation6], 0  ;;  %s26_s14 = sshll.u32 %s513_s1, 4  ;;  %s27_s14 = int_to_ptr.hbm [resolvable:$true] %s26_s14 }
   0x2   :  { %10 = vsyncpa [#allocation4], 0  ;;  %s474_s15 = smov [#allocation5]   ;;  %s16_s19 = sshll.u32 %s512_s0, 4  ;;  %s17_s19 = int_to_ptr.hbm [resolvable:$true] %s16_s19 }
   0x3   :  { %s28_s16 = sshll.u32 %s474_s15, 4  ;;  %s475_s20 = smov 64   ;;  %s29_s16 = int_to_ptr.vmem [resolvable:$true] %s28_s16 }
   0x4   :  { %s476_s21 = smov 4   ;;  %s477_s22 = smov [#allocation2]  }
   0x5   :  { %34 = dma.hbm_to_vmem [thread:$0]  %s27_s14, 2176, %s29_s16, [#allocation6], %s475_s20, %s475_s20, %s476_s21  }
   0x6   :  { %s18_s23 = sshll.u32 %s477_s22, 4  ;;  %s40_s26 = sshll.u32 %s514_s2, 4  ;;  %s19_s23 = int_to_ptr.vmem [resolvable:$true] %s18_s23  ;;  %s41_s26 = int_to_ptr.hbm [resolvable:$true] %s40_s26 }
   0x7   :  { %21 = dma.hbm_to_vmem [thread:$0]  %s17_s19, 64, %s19_s23, [#allocation3]  }
   0x8   :  { %s478_s1 = smov [#allocation7]  }
   0x9   :  { %s42_s27 = sshll.u32 %s478_s1, 4  ;;  %s43_s27 = int_to_ptr.vmem [resolvable:$true] %s42_s27 }
   0xa   :  { %45 = dma.hbm_to_vmem [thread:$0]  %s41_s26, 128, %s43_s27, [#allocation6]  }
   0xb   :  { %468 = dma.done.wait [#allocation3], 64  }
   0xc   :  { %469 = vsyncadd [#allocation3], 4294967232 }
   0xd   :  { %470 = dma.done.wait [#allocation6], 2304  }
   0xe   :  { %471 = vsyncadd [#allocation6], 4294964992  ;;  %v344_v0 = vld [vmem:[#allocation5] sm:$0xff]  ;;  %v59_v2 = vld [vmem:[#allocation2] sm:$0xf]  ;;  %vm104_vm0 = vcmask 130048   ;;  %v249_v31 = vlaneseq }
   0xf   :  { %v352_v1 = vld [vmem:[#allocation5 + $0x40] sm:$0xff]  ;;  %115 = vmatpush.bf16.msra.mxu0 %v344_v0  ;;  %v351_v3 = vld [vmem:[#allocation5 + $0x38] sm:$0xff]  ;;  %v350_v4 = vld [vmem:[#allocation5 + $0x30] sm:$0xff]  ;;  %s479_s0 = smov [#allocation8]   ;;  %s264_s30 = sshll.u32 %s515_s3, 4  ;;  %s265_s30 = int_to_ptr.hbm [resolvable:$true] %s264_s30 }
  0x10   :  { %172 = vmatpush.bf16.msra.mxu1 %v352_v1  ;;  %v349_v5 = vld [vmem:[#allocation5 + $0x28] sm:$0xff]  ;;  %v348_v6 = vld [vmem:[#allocation5 + $0x20] sm:$0xff]  ;;  %v347_v7 = vld [vmem:[#allocation5 + $0x18] sm:$0xff]  ;;  %v250_v34 = vand.u32 127, %v249_v31  ;;  %s262_s2 = sshll.u32 %s479_s0, 4  ;;  %s263_s2 = int_to_ptr.vmem [resolvable:$true] %s262_s2 }
  0x11   :  { %v346_v8 = vld [vmem:[#allocation5 + $0x10] sm:$0xff]  ;;  %v345_v9 = vld [vmem:[#allocation5 + $0x8] sm:$0xff]  ;;  %v360_v10 = vld [vmem:[#allocation5 + $0x80] sm:$0xff] }
  0x12   :  { %279 = vmatmul.msk.bf16.vlgmr.msra.gmra.mxu0 %vm104_vm0, %v59_v2  ;;  %236 = vmatpush.bf16.msra.mxu2 %v360_v10  ;;  %v359_v11 = vld [vmem:[#allocation5 + $0x78] sm:$0xff]  ;;  %v358_v12 = vld [vmem:[#allocation5 + $0x70] sm:$0xff]  ;;  %v357_v13 = vld [vmem:[#allocation5 + $0x68] sm:$0xff]  ;;  %vm251_vm1 = vcmp.lt.s32.totalorder %v250_v34, 4 }
  0x13   :  { %v356_v14 = vld [vmem:[#allocation5 + $0x60] sm:$0xff]  ;;  %v355_v15 = vld [vmem:[#allocation5 + $0x58] sm:$0xff]  ;;  %v367_v16 = vld [vmem:[#allocation7] ss:$0 sm:$0xff] }
  0x14   :  { %173 = vmatpush.bf16.msra.mxu1 %v351_v3  ;;  %v354_v22 = vld [vmem:[#allocation5 + $0x50] sm:$0xff]  ;;  %v353_v23 = vld [vmem:[#allocation5 + $0x48] sm:$0xff] }
  0x15   :  { %v368_v24 = vld [vmem:[#allocation7 + $0x1] ss:$0 sm:$0xff]  ;;  %v369_v30 = vld [vmem:[#allocation7 + $0x2] ss:$0 sm:$0xff] }
  0x16   :  { %237 = vmatpush.bf16.msra.mxu2 %v359_v11 }
  0x18   :  { %174 = vmatpush.bf16.msra.mxu1 %v350_v4 }
  0x1a   :  { %238 = vmatpush.bf16.msra.mxu2 %v358_v12 }
  0x1c   :  { %175 = vmatpush.bf16.msra.mxu1 %v349_v5 }
  0x1e   :  { %239 = vmatpush.bf16.msra.mxu2 %v357_v13 }
  0x20   :  { %176 = vmatpush.bf16.msra.mxu1 %v348_v6 }
  0x22   :  { %240 = vmatpush.bf16.msra.mxu2 %v356_v14 }
  0x24   :  { %177 = vmatpush.bf16.msra.mxu1 %v347_v7 }
  0x26   :  { %241 = vmatpush.bf16.msra.mxu2 %v355_v15 }
  0x28   :  { %178 = vmatpush.bf16.msra.mxu1 %v346_v8 }
  0x2a   :  { %242 = vmatpush.bf16.msra.mxu2 %v354_v22 }
  0x2c   :  { %179 = vmatpush.bf16.msra.mxu1 %v345_v9 }
  0x2e   :  { %243 = vmatpush.bf16.msra.mxu2 %v353_v23 }
  0x8f   :  { %v117_v17 = vpop.f32.mrf.mxu0 }
  0x90   :  { %v118_v18 = vadd.f32 %v367_v16, %v117_v17 }
  0x92   :  { %v121_v19 = vmax.f32 %v118_v18, 0.0 }
  0x94   :  { %v122_v20 = vpack.c.bf16 %v121_v19, %v121_v19 }
  0x96   :  { %180 = vmatmul.bf16.vlgmr.msra.gmra.mxu1 %v122_v20 }
  0x97   :  { %v119_v21 = vpop.f32.mrf.mxu0 }
 0x113   :  { %v181_v25 = vpop.f32.mrf.mxu1 }
 0x114   :  { %v182_v26 = vadd.f32 %v368_v24, %v181_v25 }
 0x116   :  { %v185_v27 = vmax.f32 %v182_v26, 0.0 }
 0x118   :  { %v186_v28 = vpack.c.bf16 %v185_v27, %v185_v27 }
 0x11a   :  { %244 = vmatmul.bf16.vlgmr.msra.gmra.mxu2 %v186_v28 }
 0x11b   :  { %v183_v29 = vpop.f32.mrf.mxu1 }
 0x19d   :  { %v245_v32 = vpop.f32.mrf.mxu2 }
 0x19e   :  { %v246_v33 = vadd.f32 %v369_v30, %v245_v32 }
 0x1a0   :  { %370 = vtanh.f32 %v246_v33 }
 0x1a5   :  { %v247_v35 = vpop.f32.mrf.mxu2 }
 0x1a6   :  { %v371_v36 = vpop.eup %370 }
 0x1a7   :  { %v255_v37 = vsel %vm251_vm1, %v371_v36, %v246_v33 }
 0x1a8   :  { %256 = vst [vmem:[#allocation8] sm:$0xff] %v255_v37 }
 0x1a9   :  { %267 = dma.vmem_to_hbm [thread:$0]  %s263_s2, 128, %s265_s30, [#allocation4]  }
 0x1aa   :  { %472 = dma.done.wait [#allocation4], 128  }
 0x1ab   :  { %473 = vsyncadd [#allocation4], 4294967168 }
 0x1ac   :  { %272 = vsyncpa [#allocation3], 1 }
 0x1ad   :  { %273 = vsyncpa [#allocation6], 1 }
 0x1ae   :  { %274 = vsyncpa [#allocation4], 1 }

</bundles_post_ra>
